<compile_context>
chip_gen: v7x
topology: tpu7x:2x2x1
jax: 0.10.0
libtpu: 0.0.40
codegen_flags: <defaults>
</compile_context>

<pallas_src>
import functools

import jax
import jax.numpy as jnp
from jax.experimental import pallas as pl
from jax.experimental.pallas import tpu as pltpu


def _round_up(x, m):
    return ((x + m - 1) // m) * m


def _layernorm_kernel(x_ref, a2_ref, b2_ref, o_ref, *, eps, d_model):
    x = x_ref[...].astype(jnp.float32)                        # (T, d) dense slab
    mean = jnp.mean(x, axis=-1, keepdims=True)
    xc = x - mean
    # torch.Tensor.std uses Bessel's correction (divide by d-1), and the
    # PyTorch module divides by (std + eps), not sqrt(var + eps).
    var = jnp.sum(xc * xc, axis=-1, keepdims=True) / (d_model - 1)
    std = jnp.sqrt(var)
    y = a2_ref[...] * (xc / (std + eps)) + b2_ref[...]
    o_ref[...] = y.astype(o_ref.dtype)


def layer_norm_pallas(x, a2, b2, *, eps=1e-6, block_rows=256):
    """Encoder.norm: a2 * (x - mean) / (std + eps) + b2 over the last dim."""
    *lead, d = x.shape
    xf = x.reshape(-1, d)
    n = xf.shape[0]

    # Dense (T, d) tiles: T a multiple of 8 (sublane axis), d full (lane axis).
    T = min(block_rows, _round_up(n, 8))
    n_pad = _round_up(n, T)
    if n_pad != n:
        xf = jnp.pad(xf, ((0, n_pad - n), (0, 0)))
    grid = (n_pad // T,)

    a2_2d = a2.reshape(1, d).astype(jnp.float32)
    b2_2d = b2.reshape(1, d).astype(jnp.float32)

    cost = pl.CostEstimate(
        flops=8 * n_pad * d,
        transcendentals=n_pad,
        bytes_accessed=2 * n_pad * d * 4 + 2 * d * 4,
    )

    out = pl.pallas_call(
        functools.partial(_layernorm_kernel, eps=eps, d_model=d),
        out_shape=jax.ShapeDtypeStruct((n_pad, d), x.dtype),
        grid_spec=pltpu.PrefetchScalarGridSpec(
            num_scalar_prefetch=0,
            grid=grid,
            in_specs=[
                pl.BlockSpec((T, d), lambda i: (i, 0)),   # row slab of x
                pl.BlockSpec((1, d), lambda i: (0, 0)),   # a2 (gain), resident
                pl.BlockSpec((1, d), lambda i: (0, 0)),   # b2 (bias), resident
            ],
            out_specs=pl.BlockSpec((T, d), lambda i: (i, 0)),
        ),
        compiler_params=pltpu.CompilerParams(
            dimension_semantics=("parallel",),
        ),
        cost_estimate=cost,
    )(xf, a2_2d, b2_2d)

    if n_pad != n:
        out = out[:n]
    return out.reshape(*lead, d)


def encoder_forward(x, mask, layer_fns, a2, b2, *, eps=1e-6):
    """Encoder.forward: apply each layer, then the final LayerNorm."""
    # TODO(synk): EncoderLayer (self-attention + feed-forward sublayers) is a
    # constructor argument not defined in the provided spec; any supplied layer
    # callables are applied here as-is before the Pallas LayerNorm.
    for layer_fn in layer_fns:
        x = layer_fn(x, mask)
    return layer_norm_pallas(x, a2, b2, eps=eps)


if __name__ == "__main__":
    # Small deterministic setup consistent with a transformer encoder:
    #   batch=2, seq=8, d_model=128 (lane-dense feature dim).
    B, S, D = 2, 8, 128
    eps = 1e-6

    key = jax.random.PRNGKey(0)
    k_x, _ = jax.random.split(key)
    x = jax.random.normal(k_x, (B, S, D), dtype=jnp.float32)
    mask = jnp.ones((B, 1, S), dtype=jnp.float32)  # consumed only by layers

    # LayerNorm params at their nn.Parameter init values (ones / zeros).
    a2 = jnp.ones((D,), dtype=jnp.float32)
    b2 = jnp.zeros((D,), dtype=jnp.float32)

    out = encoder_forward(x, mask, layer_fns=(), a2=a2, b2=b2, eps=eps)
    out = jax.block_until_ready(out)

    # Pure-JAX reference with exact PyTorch semantics (unbiased std, std+eps).
    mean = x.mean(-1, keepdims=True)
    std = jnp.std(x, axis=-1, ddof=1, keepdims=True)
    ref = a2 * (x - mean) / (std + eps) + b2

    assert out.shape == (B, S, D)
    assert jnp.allclose(out, ref, atol=1e-5, rtol=1e-5), (
        float(jnp.max(jnp.abs(out - ref)))
    )
    print("KERNEL_OK")
</pallas_src>

<mosaic_0001>
module attributes {stable_mosaic.version = 11 : i64} {
  func.func @_layernorm_kernel(%arg0: i32, %arg1: memref<16x128xf32, #tpu.memory_space<vmem>>, %arg2: memref<1x128xf32, #tpu.memory_space<vmem>>, %arg3: memref<1x128xf32, #tpu.memory_space<vmem>>, %arg4: memref<16x128xf32, #tpu.memory_space<vmem>>) attributes {dimension_semantics = [#tpu.dimension_semantics<parallel>], iteration_bounds = array<i64: 1>, scalar_prefetch = 0 : i64, scratch_operands = 0 : i64, tpu.core_type = #tpu.core_type<tc>, window_params = [{transform_indices = @transform_0, window_bounds = array<i64: 16, 128>}, {pipeline_mode = #tpu.pipeline_mode<synchronous>, transform_indices = @transform_1, window_bounds = array<i64: 1, 128>}, {pipeline_mode = #tpu.pipeline_mode<synchronous>, transform_indices = @transform_2, window_bounds = array<i64: 1, 128>}, {transform_indices = @transform_3, window_bounds = array<i64: 16, 128>}]} {
    %c0 = arith.constant 0 : index
    %c0_0 = arith.constant 0 : index
    %0 = vector.load %arg1[%c0, %c0_0] : memref<16x128xf32, #tpu.memory_space<vmem>>, vector<16x128xf32>
    %cst = arith.constant dense<0.000000e+00> : vector<16xf32>
    %1 = vector.multi_reduction <add>, %0, %cst [1] : vector<16x128xf32> to vector<16xf32>
    %2 = vector.shape_cast %1 : vector<16xf32> to vector<16x1xf32>
    %cst_1 = arith.constant 1.280000e+02 : f32
    %3 = vector.broadcast %cst_1 : f32 to vector<16x1xf32>
    %4 = arith.divf %2, %3 : vector<16x1xf32>
    %5 = vector.broadcast %4 : vector<16x1xf32> to vector<16x128xf32>
    %6 = arith.subf %0, %5 : vector<16x128xf32>
    %7 = arith.mulf %6, %6 : vector<16x128xf32>
    %cst_2 = arith.constant dense<0.000000e+00> : vector<16xf32>
    %8 = vector.multi_reduction <add>, %7, %cst_2 [1] : vector<16x128xf32> to vector<16xf32>
    %9 = vector.shape_cast %8 : vector<16xf32> to vector<16x1xf32>
    %cst_3 = arith.constant 1.270000e+02 : f32
    %10 = vector.broadcast %cst_3 : f32 to vector<16x1xf32>
    %11 = arith.divf %9, %10 : vector<16x1xf32>
    %12 = math.sqrt %11 : vector<16x1xf32>
    %c0_4 = arith.constant 0 : index
    %c0_5 = arith.constant 0 : index
    %13 = vector.load %arg2[%c0_4, %c0_5] : memref<1x128xf32, #tpu.memory_space<vmem>>, vector<1x128xf32>
    %cst_6 = arith.constant 9.99999997E-7 : f32
    %14 = vector.broadcast %cst_6 : f32 to vector<16x1xf32>
    %15 = arith.addf %12, %14 : vector<16x1xf32>
    %16 = vector.broadcast %15 : vector<16x1xf32> to vector<16x128xf32>
    %17 = arith.divf %6, %16 : vector<16x128xf32>
    %18 = vector.broadcast %13 : vector<1x128xf32> to vector<16x128xf32>
    %19 = arith.mulf %18, %17 : vector<16x128xf32>
    %c0_7 = arith.constant 0 : index
    %c0_8 = arith.constant 0 : index
    %20 = vector.load %arg3[%c0_7, %c0_8] : memref<1x128xf32, #tpu.memory_space<vmem>>, vector<1x128xf32>
    %21 = vector.broadcast %20 : vector<1x128xf32> to vector<16x128xf32>
    %22 = arith.addf %19, %21 : vector<16x128xf32>
    %c0_9 = arith.constant 0 : index
    %c0_10 = arith.constant 0 : index
    %23 = vector.load %arg4[%c0_9, %c0_10] : memref<16x128xf32, #tpu.memory_space<vmem>>, vector<16x128xf32>
    tpu.vector_store %arg4[%c0_9, %c0_10], %22 {strides = array<i32>} : memref<16x128xf32, #tpu.memory_space<vmem>>, vector<16x128xf32>,
    return
  }
  func.func @transform_0(%arg0: i32) -> (i32, i32) {
    %c0_i32 = arith.constant 0 : i32
    %c0_i32_0 = arith.constant 0 : i32
    return %arg0, %c0_i32 : i32, i32
  }
  func.func @transform_1(%arg0: i32) -> (i32, i32) {
    %c0_i32 = arith.constant 0 : i32
    %c0_i32_0 = arith.constant 0 : i32
    %c0_i32_1 = arith.constant 0 : i32
    return %c0_i32, %c0_i32_0 : i32, i32
  }
  func.func @transform_2(%arg0: i32) -> (i32, i32) {
    %c0_i32 = arith.constant 0 : i32
    %c0_i32_0 = arith.constant 0 : i32
    %c0_i32_1 = arith.constant 0 : i32
    return %c0_i32, %c0_i32_0 : i32, i32
  }
  func.func @transform_3(%arg0: i32) -> (i32, i32) {
    %c0_i32 = arith.constant 0 : i32
    %c0_i32_0 = arith.constant 0 : i32
    return %arg0, %c0_i32 : i32, i32
  }
}

</mosaic_0001>

<bundles_post_ra>
// kernel: tpu_custom_call.1
= control target key start
LH: loop header
LB: loop body
LE: loop exit
PB: predicated region body
PF: predicated region fallthrough
CT: control target
= control target key end

     0   :  { %8 = vsyncpa [#allocation3], 0  ;;  %s228_s0 = inlined_call_operand.hbm [shape: f32[16,128], index: 0, kind: input, shape index: {}]   ;;  %s229_s1 = inlined_call_operand.vmem [shape: f32[1,128], index: 1, kind: input, shape index: {}]   ;;  %s230_s2 = inlined_call_operand.vmem [shape: f32[1,128], index: 2, kind: input, shape index: {}]   ;;  %s231_s3 = inlined_call_operand.hbm [shape: f32[16,128], index: 3, kind: output, shape index: {}]  }
   0x1   :  { %9 = vsyncpa [#allocation4], 0  ;;  %s168_s12 = smov [#allocation2]   ;;  %s120_s16 = scalar_lea.hbm %s228_s0, 256 }
   0x2   :  { %s15_s13 = sshll.u32 %s168_s12, 4  ;;  %p121_p0 = scmp.ne.s32.totalorder %s228_s0, %s120_s16  ;;  %s16_s13 = int_to_ptr.vmem [resolvable:$true] %s15_s13 }
   0x3   :  { %p124_p1 = scmp.lt.u32.totalorder %s120_s16, %s228_s0 }
   0x5   :  { %p126_p2 = pnand %p124_p1, %p121_p0 }
   0x7   :  { %129 = shalt.err (!%p126_p2)
}
   0x8   :  { %s130_s21 = scalar_lea.vmem %s16_s13, 256  ;;  %p135_p4 = scmp.lt.s32.totalorder %s16_s13, %s16_s13 }
   0x9   :  { %p131_p3 = scmp.ne.s32.totalorder %s16_s13, %s130_s21  ;;  %p136_p5 = scmp.lt.s32.totalorder %s130_s21, %s130_s21 }
   0xb   :  { %p137_p6 = por %p136_p5, %p135_p4 }
   0xd   :  { %p138_p7 = pnand %p137_p6, %p131_p3 }
   0xf   :  { %141 = shalt.err (!%p138_p7)
}
  0x10   :  { %s169_s22 = smov 128   ;;  %s170_s23 = smov 8  }
  0x11   :  { %21 = dma.hbm_to_vmem [thread:$0]  %s228_s0, 256, %s16_s13, [#allocation3], %s169_s22, %s169_s22, %s170_s23  }
  0x12   :  { %164 = dma.done.wait [#allocation3], 256  }
  0x13   :  { %165 = vsyncadd [#allocation3], 4294967040  ;;  %v29_v0 = vld [vmem:[#allocation2] sm:$0xff]  ;;  %v30_v1 = vld [vmem:[#allocation2 + $0x8] sm:$0xff]  ;;  %s171_s29 = smov [#allocation5]  }
  0x14   :  { %31 = vadd.xlane.f32.xlu0 %v29_v0  ;;  %v106_v27 = vld [vmem:[%s229_s1] ss:$0 sm:$0xff]  ;;  %s94_s30 = sshll.u32 %s171_s29, 4  ;;  %s95_s30 = int_to_ptr.vmem [resolvable:$true] %s94_s30 }
  0x15   :  { %v107_v29 = vld [vmem:[%s230_s2] ss:$0 sm:$0xff]  ;;  %s142_s4 = scalar_lea.vmem %s95_s30, 256  ;;  %p147_p9 = scmp.lt.s32.totalorder %s95_s30, %s95_s30 }
  0x16   :  { %p143_p8 = scmp.ne.s32.totalorder %s95_s30, %s142_s4  ;;  %p148_p10 = scmp.lt.s32.totalorder %s142_s4, %s142_s4 }
  0x18   :  { %33 = vadd.xlane.f32.xlu0 %v30_v1  ;;  %p149_p11 = por %p148_p10, %p147_p9 }
  0x1a   :  { %p150_p12 = pnand %p149_p11, %p143_p8 }
  0xa1   :  { %v32_v2 = vpop.xlane.xlu0 %31 }
  0xa2   :  { %v36_v3 = vmul.f32 0.0078125, %v32_v2 }
  0xa4   :  { %v38_v4 = vsub.f32 %v29_v0, %v36_v3 }
  0xa5   :  { %v34_v5 = vpop.xlane.xlu0 %33 }
  0xa6   :  { %v37_v6 = vmul.f32 0.0078125, %v34_v5  ;;  %v40_v7 = vmul.f32 %v38_v4, %v38_v4 }
  0xa8   :  { %v39_v8 = vsub.f32 %v30_v1, %v37_v6  ;;  %42 = vadd.xlane.f32.xlu1 %v40_v7 }
  0xaa   :  { %v41_v9 = vmul.f32 %v39_v8, %v39_v8 }
  0xac   :  { %44 = vadd.xlane.f32.xlu1 %v41_v9 }
 0x135   :  { %v43_v10 = vpop.xlane.xlu1 %42 }
 0x136   :  { %v47_v11 = vmul.f32 0.007874016, %v43_v10 }
 0x138   :  { %112 = vrsqrt.f32 %v47_v11  ;;  %vm51_vm0 = vcmp.eq.f32.partialorder %v47_v11, inf  ;;  %v54_v16 = vand.u32 2147483648, %v47_v11  ;;  %vm53_vm1 = vcmp.eq.f32.partialorder %v47_v11, 0.0 }
 0x139   :  { %v45_v12 = vpop.xlane.xlu1 %44 }
 0x13a   :  { %v48_v13 = vmul.f32 0.007874016, %v45_v12 }
 0x13c   :  { %114 = vrsqrt.f32 %v48_v13  ;;  %vm58_vm2 = vcmp.eq.f32.partialorder %v48_v13, inf  ;;  %v61_v22 = vand.u32 2147483648, %v48_v13  ;;  %vm60_vm3 = vcmp.eq.f32.partialorder %v48_v13, 0.0 }
 0x142   :  { %v113_v14 = vpop.eup %112 }
 0x143   :  { %v50_v15 = vmul.f32 %v113_v14, %v47_v11 }
 0x145   :  { %v52_v17 = vsel %vm51_vm0, %v47_v11, %v50_v15 }
 0x146   :  { %v115_v18 = vpop.eup %114  ;;  %v55_v19 = vsel %vm53_vm1, %v54_v16, %v52_v17 }
 0x147   :  { %v57_v20 = vmul.f32 %v115_v18, %v48_v13  ;;  %v64_v21 = vadd.f32 1e-06, %v55_v19 }
 0x149   :  { %v59_v23 = vsel %vm58_vm2, %v48_v13, %v57_v20  ;;  %116 = vrcp.f32 %v64_v21 }
 0x14a   :  { %v62_v24 = vsel %vm60_vm3, %v61_v22, %v59_v23 }
 0x14b   :  { %v65_v25 = vadd.f32 1e-06, %v62_v24 }
 0x14d   :  { %118 = vrcp.f32 %v65_v25 }
 0x153   :  { %v117_v26 = vpop.eup %116 }
 0x154   :  { %v67_v28 = vmul.f32 %v117_v26, %v38_v4 }
 0x156   :  { %v76_v30 = vmul.f32 %v106_v27, %v67_v28 }
 0x157   :  { %v119_v31 = vpop.eup %118 }
 0x158   :  { %v69_v32 = vmul.f32 %v119_v31, %v39_v8  ;;  %v85_v33 = vadd.f32 %v107_v29, %v76_v30 }
 0x15a   :  { %v77_v34 = vmul.f32 %v106_v27, %v69_v32  ;;  %87 = vst [vmem:[#allocation5] sm:$0xff] %v85_v33 }
 0x15c   :  { %v86_v35 = vadd.f32 %v107_v29, %v77_v34 }
 0x15e   :  { %88 = vst [vmem:[#allocation5 + $0x8] sm:$0xff] %v86_v35 }
 0x15f   :  { %153 = shalt.err (!%p150_p12)
}
 0x160   :  { %s154_s5 = scalar_lea.hbm %s231_s3, 256 }
 0x161   :  { %p155_p13 = scmp.ne.s32.totalorder %s231_s3, %s154_s5  ;;  %p158_p0 = scmp.lt.u32.totalorder %s154_s5, %s231_s3 }
 0x163   :  { %p160_p1 = pnand %p158_p0, %p155_p13 }
 0x165   :  { %163 = shalt.err (!%p160_p1)
}
 0x166   :  { %100 = dma.vmem_to_hbm [thread:$0]  %s95_s30, 256, %s231_s3, [#allocation4], %s169_s22, %s169_s22, %s170_s23  }
 0x167   :  { %166 = dma.done.wait [#allocation4], 256  }
 0x168   :  { %167 = vsyncadd [#allocation4], 4294967040 }
 0x169   :  { %104 = vsyncpa [#allocation3], 1 }
 0x16a   :  { %105 = vsyncpa [#allocation4], 1 }

</bundles_post_ra>
